<compile_context>
chip_gen: v7x
topology: tpu7x:2x2x1
jax: 0.10.0
libtpu: 0.0.40
codegen_flags: <defaults>
</compile_context>

<pallas_src>
import jax
import jax.numpy as jnp
from jax import lax
from jax.experimental import pallas as pl
from jax.experimental.pallas import tpu as pltpu


def _round_up(v, m):
    return ((v + m - 1) // m) * m


# ------------------------------ kernel ----------------------------------------

def _gcn_kernel(a_ref, y_ref, e_ref, o_ref):
    """o[i] = sum_k A[i,k] @ Y[k]  (+ E at the last k step).

    The f32 output block (BlockSpec index (i, 0)) stays VMEM-resident across
    the whole k sweep, so it doubles as the accumulator (no scratch needed).
    E is either a (1, out_pad) bias row or a (tm, out_pad) x0-projection+bias
    slab; jnp broadcasting handles both.
    """
    k = pl.program_id(1)

    @pl.when(k == 0)
    def _():
        o_ref[...] = jnp.zeros_like(o_ref)

    o_ref[...] += jnp.dot(a_ref[...], y_ref[...],
                          preferred_element_type=jnp.float32)

    @pl.when(k == pl.num_programs(1) - 1)
    def _():
        o_ref[...] = o_ref[...] + e_ref[...]


# ------------------------------ wrapper ----------------------------------------

def graph_conv_layer(x, edge_index, edge_weight, x0, W, b,
                     use_weight=True, use_init=False,
                     tm=1024, tk=2048, stream_dtype=jnp.bfloat16,
                     vmem_budget_bytes=40 * 1024 * 1024):
    """Pallas implementation of GraphConvLayer.forward."""
    N, C = x.shape
    row, col = edge_index[0], edge_index[1]

    out_dim = W.shape[0] if use_weight else C
    out_pad = _round_up(out_dim, 128)                 # lane-dense output slab

    # ---- tile selection (v7x-safe VMEM budget, >=2 row tiles for megacore) ----
    n128 = _round_up(N, 128)
    tm = min(tm, n128)
    tk = min(tk, n128)
    if n128 // tm < 2 and n128 >= 256:                # give both TCs work
        tm = _round_up(n128 // 2, 128)

    esz = jnp.dtype(stream_dtype).itemsize

    def _vmem_bytes(tm_, tk_):
        a = 2 * tm_ * tk_ * esz                       # A double-buffered
        y = 2 * tk_ * out_pad * esz                   # Y double-buffered
        o = 2 * tm_ * out_pad * 4                     # f32 output/accumulator
        e = 2 * (tm_ if use_init else 1) * out_pad * 4
        return a + y + o + e

    while _vmem_bytes(tm, tk) > vmem_budget_bytes and tk > 128:
        tk = max(128, _round_up(tk // 2, 128))
    while _vmem_bytes(tm, tk) > vmem_budget_bytes and tm > 128:
        tm = max(128, _round_up(tm // 2, 128))

    Np_m = _round_up(N, tm)
    Np_k = _round_up(N, tk)

    # ---- glue: degree normalization + padded dense adjacency ------------------
    d = jnp.zeros((N,), jnp.float32).at[col].add(1.0)          # degree(col, N)
    value = (edge_weight.astype(jnp.float32)
             * jnp.sqrt(1.0 / d[col]) * jnp.sqrt(1.0 / d[row]))
    value = jnp.nan_to_num(value, nan=0.0, posinf=0.0, neginf=0.0)
    # SparseTensor(row=col, col=row, value=value) => A[col[e], row[e]] += value[e]
    # Scatter in f32 directly at the padded shape (duplicate edges stay exact),
    # then cast once to the streaming dtype: 2 HBM passes instead of 4.
    A_p = (jnp.zeros((Np_m, Np_k), jnp.float32)
           .at[col, row].add(value)
           .astype(stream_dtype))

    # ---- right-associate the Linear layer: (A@x)@Wa == A@(x@Wa) ---------------
    hi = lax.Precision.HIGHEST
    if use_weight:
        Wt = W.T                                       # [in_channels_, out_dim]
        Y = jnp.dot(x.astype(stream_dtype), Wt[:C].astype(stream_dtype),
                    preferred_element_type=jnp.float32, precision=hi)
        Y_p = jnp.pad(Y.astype(stream_dtype),
                      ((0, Np_k - N), (0, out_pad - out_dim)))
        if use_init:
            # epilogue term E = x0 @ W0 + b  (bias folded in)
            E = jnp.dot(x0.astype(stream_dtype), Wt[C:].astype(stream_dtype),
                        preferred_element_type=jnp.float32, precision=hi)
            E = E + b.astype(jnp.float32)[None, :]
            E_p = jnp.pad(E, ((0, Np_m - N), (0, out_pad - out_dim)))
            e_spec = pl.BlockSpec((tm, out_pad), lambda i, k: (i, 0))
        else:
            E_p = jnp.pad(b.astype(jnp.float32),
                          (0, out_pad - out_dim)).reshape(1, out_pad)
            e_spec = pl.BlockSpec((1, out_pad), lambda i, k: (0, 0))
    else:
        Y_p = jnp.pad(x.astype(stream_dtype),
                      ((0, Np_k - N), (0, out_pad - out_dim)))
        E_p = jnp.zeros((1, out_pad), jnp.float32)     # tiny no-op epilogue
        e_spec = pl.BlockSpec((1, out_pad), lambda i, k: (0, 0))

    out = pl.pallas_call(
        _gcn_kernel,
        out_shape=jax.ShapeDtypeStruct((Np_m, out_pad), jnp.float32),
        grid_spec=pltpu.PrefetchScalarGridSpec(
            num_scalar_prefetch=0,
            grid=(Np_m // tm, Np_k // tk),
            in_specs=[
                pl.BlockSpec((tm, tk), lambda i, k: (i, k)),       # A tile
                pl.BlockSpec((tk, out_pad), lambda i, k: (k, 0)),  # Y k-tile
                e_spec,                                            # epilogue
            ],
            out_specs=pl.BlockSpec((tm, out_pad), lambda i, k: (i, 0)),
        ),
        compiler_params=pltpu.CompilerParams(
            dimension_semantics=("parallel", "arbitrary"),
            vmem_limit_bytes=48 * 1024 * 1024,
        ),
    )(A_p, Y_p, E_p)
    return out[:N, :out_dim]


# ------------------------------ reference --------------------------------------

def _reference(x, edge_index, edge_weight, x0, W, b, use_weight, use_init):
    N = x.shape[0]
    row, col = edge_index[0], edge_index[1]
    d = jnp.zeros((N,), jnp.float32).at[col].add(1.0)
    value = edge_weight * jnp.sqrt(1.0 / d[col]) * jnp.sqrt(1.0 / d[row])
    value = jnp.nan_to_num(value, nan=0.0, posinf=0.0, neginf=0.0)
    A = jnp.zeros((N, N), jnp.float32).at[col, row].add(value)
    h = jnp.dot(A, x, precision=lax.Precision.HIGHEST)
    if use_init:
        h = jnp.concatenate([h, x0], axis=1)
    if use_weight:
        h = jnp.dot(h, W.T, precision=lax.Precision.HIGHEST) + b
    return h


def _make_inputs(key, N, C_in, C_out, E):
    k1, k2, k3, k4, k5, k6, k7, k8, k9 = jax.random.split(key, 9)
    x = jax.random.normal(k1, (N, C_in), jnp.float32)
    x0 = jax.random.normal(k2, (N, C_in), jnp.float32)
    row = jax.random.randint(k3, (E,), 0, N, jnp.int32)
    col = jax.random.randint(k4, (E,), 0, N, jnp.int32)
    edge_index = jnp.stack([row, col], axis=0)
    edge_weight = jax.random.uniform(k5, (E,), jnp.float32)
    # deterministic nn.Linear-style init: U(-1/sqrt(fan_in), 1/sqrt(fan_in))
    bound1 = 1.0 / (C_in ** 0.5)
    W1 = jax.random.uniform(k6, (C_out, C_in), jnp.float32, -bound1, bound1)
    b1 = jax.random.uniform(k7, (C_out,), jnp.float32, -bound1, bound1)
    bound2 = 1.0 / ((2 * C_in) ** 0.5)
    W2 = jax.random.uniform(k8, (C_out, 2 * C_in), jnp.float32, -bound2, bound2)
    b2 = jax.random.uniform(k9, (C_out,), jnp.float32, -bound2, bound2)
    return x, x0, edge_index, edge_weight, W1, b1, W2, b2


if __name__ == "__main__":
    key = jax.random.PRNGKey(0)
    ksmall, klarge = jax.random.split(key)

    # ---------------- small graph (single tile) ----------------
    N, C_in, C_out, E = 16, 32, 32, 48
    x, x0, ei, ew, W1, b1, W2, b2 = _make_inputs(ksmall, N, C_in, C_out, E)

    # 1) module defaults (use_weight=True, use_init=False), bf16 streams.
    out = jax.block_until_ready(graph_conv_layer(
        x, ei, ew, x0, W1, b1, use_weight=True, use_init=False))
    ref = _reference(x, ei, ew, x0, W1, b1, True, False)
    assert out.shape == (N, C_out)
    assert jnp.allclose(out, ref, atol=1e-1, rtol=1e-1)

    # 2) same config with f32 streams: tight tolerance proves exact indexing.
    out_f32 = jax.block_until_ready(graph_conv_layer(
        x, ei, ew, x0, W1, b1, use_weight=True, use_init=False,
        stream_dtype=jnp.float32))
    assert jnp.allclose(out_f32, ref, atol=1e-4, rtol=1e-4)

    # 3) use_init=True branch (bias folded into the x0-projection epilogue).
    out_i = jax.block_until_ready(graph_conv_layer(
        x, ei, ew, x0, W2, b2, use_weight=True, use_init=True))
    ref_i = _reference(x, ei, ew, x0, W2, b2, True, True)
    assert out_i.shape == (N, C_out)
    assert jnp.allclose(out_i, ref_i, atol=1e-1, rtol=1e-1)

    # 4) use_weight=False branch (pure aggregation).
    out_a = jax.block_until_ready(graph_conv_layer(
        x, ei, ew, x0, W1, b1, use_weight=False, use_init=False))
    ref_a = _reference(x, ei, ew, x0, W1, b1, False, False)
    assert out_a.shape == (N, C_in)
    assert jnp.allclose(out_a, ref_a, atol=1e-1, rtol=1e-1)

    # ---------------- larger graph (multi-tile grid + ragged padding) ----------
    N2, C2_in, C2_out, E2 = 1000, 64, 64, 5000
    x, x0, ei, ew, W1, b1, W2, b2 = _make_inputs(klarge, N2, C2_in, C2_out, E2)

    # 5) bf16 streams, default config: exercises 2 row tiles (megacore split).
    out_l = jax.block_until_ready(graph_conv_layer(
        x, ei, ew, x0, W1, b1, use_weight=True, use_init=False))
    ref_l = _reference(x, ei, ew, x0, W1, b1, True, False)
    assert out_l.shape == (N2, C2_out)
    assert jnp.allclose(out_l, ref_l, atol=1e-1, rtol=1e-1)

    # 6) f32 streams with small tiles: exercises multi k-tile accumulation
    #    into the resident output block with tight tolerance.
    out_lf = jax.block_until_ready(graph_conv_layer(
        x, ei, ew, x0, W1, b1, use_weight=True, use_init=False,
        tm=256, tk=256, stream_dtype=jnp.float32))
    assert jnp.allclose(out_lf, ref_l, atol=1e-3, rtol=1e-3)

    print("KERNEL_OK")
</pallas_src>

<mosaic_0001>
module attributes {stable_mosaic.version = 11 : i64} {
  func.func @_gcn_kernel(%arg0: i32, %arg1: i32, %arg2: memref<128x128xbf16, #tpu.memory_space<vmem>>, %arg3: memref<128x128xbf16, #tpu.memory_space<vmem>>, %arg4: memref<1x128xf32, #tpu.memory_space<vmem>>, %arg5: memref<128x128xf32, #tpu.memory_space<vmem>>) attributes {dimension_semantics = [#tpu.dimension_semantics<parallel>, #tpu.dimension_semantics<arbitrary>], iteration_bounds = array<i64: 1, 1>, scalar_prefetch = 0 : i64, scratch_operands = 0 : i64, tpu.core_type = #tpu.core_type<tc>, window_params = [{transform_indices = @transform_0, window_bounds = array<i64: 128, 128>}, {transform_indices = @transform_1, window_bounds = array<i64: 128, 128>}, {pipeline_mode = #tpu.pipeline_mode<synchronous>, transform_indices = @transform_2, window_bounds = array<i64: 1, 128>}, {transform_indices = @transform_3, window_bounds = array<i64: 128, 128>}]} {
    %c0_i32 = arith.constant 0 : i32
    %0 = arith.cmpi eq, %arg1, %c0_i32 : i32
    %1 = arith.extui %0 : i1 to i32
    %c0_i32_0 = arith.constant 0 : i32
    %2 = arith.cmpi ne, %1, %c0_i32_0 : i32
    scf.if %2 {
      %cst_10 = arith.constant 0.000000e+00 : f32
      %12 = vector.broadcast %cst_10 : f32 to vector<128x128xf32>
      %c0_11 = arith.constant 0 : index
      %c0_12 = arith.constant 0 : index
      %13 = vector.load %arg5[%c0_11, %c0_12] : memref<128x128xf32, #tpu.memory_space<vmem>>, vector<128x128xf32>
      tpu.vector_store %arg5[%c0_11, %c0_12], %12 {strides = array<i32>} : memref<128x128xf32, #tpu.memory_space<vmem>>, vector<128x128xf32>,
    } else {
    }
    %c0 = arith.constant 0 : index
    %c0_1 = arith.constant 0 : index
    %3 = vector.load %arg5[%c0, %c0_1] : memref<128x128xf32, #tpu.memory_space<vmem>>, vector<128x128xf32>
    %c0_2 = arith.constant 0 : index
    %c0_3 = arith.constant 0 : index
    %4 = vector.load %arg2[%c0_2, %c0_3] : memref<128x128xbf16, #tpu.memory_space<vmem>>, vector<128x128xbf16>
    %c0_4 = arith.constant 0 : index
    %c0_5 = arith.constant 0 : index
    %5 = vector.load %arg3[%c0_4, %c0_5] : memref<128x128xbf16, #tpu.memory_space<vmem>>, vector<128x128xbf16>
    %cst = arith.constant dense<0.000000e+00> : vector<128x128xf32>
    %6 = tpu.matmul %4, %5, %cst {dimension_numbers = #tpu.dot_dimension_numbers<[1], [0], [0], [1], [0, 0, 1, 1], [], []>} : vector<128x128xbf16>, vector<128x128xbf16>, vector<128x128xf32> -> vector<128x128xf32>
    %7 = arith.addf %3, %6 : vector<128x128xf32>
    %c0_6 = arith.constant 0 : index
    %c0_7 = arith.constant 0 : index
    %8 = vector.load %arg5[%c0_6, %c0_7] : memref<128x128xf32, #tpu.memory_space<vmem>>, vector<128x128xf32>
    tpu.vector_store %arg5[%c0_6, %c0_7], %7 {strides = array<i32>} : memref<128x128xf32, #tpu.memory_space<vmem>>, vector<128x128xf32>,
    %c0_i32_8 = arith.constant 0 : i32
    %9 = arith.cmpi eq, %arg1, %c0_i32_8 : i32
    %10 = arith.extui %9 : i1 to i32
    %c0_i32_9 = arith.constant 0 : i32
    %11 = arith.cmpi ne, %10, %c0_i32_9 : i32
    scf.if %11 {
      %c0_10 = arith.constant 0 : index
      %c0_11 = arith.constant 0 : index
      %12 = vector.load %arg5[%c0_10, %c0_11] : memref<128x128xf32, #tpu.memory_space<vmem>>, vector<128x128xf32>
      %c0_12 = arith.constant 0 : index
      %c0_13 = arith.constant 0 : index
      %13 = vector.load %arg4[%c0_12, %c0_13] : memref<1x128xf32, #tpu.memory_space<vmem>>, vector<1x128xf32>
      %14 = vector.broadcast %13 : vector<1x128xf32> to vector<128x128xf32>
      %15 = arith.addf %12, %14 : vector<128x128xf32>
      %c0_14 = arith.constant 0 : index
      %c0_15 = arith.constant 0 : index
      %16 = vector.load %arg5[%c0_14, %c0_15] : memref<128x128xf32, #tpu.memory_space<vmem>>, vector<128x128xf32>
      tpu.vector_store %arg5[%c0_14, %c0_15], %15 {strides = array<i32>} : memref<128x128xf32, #tpu.memory_space<vmem>>, vector<128x128xf32>,
    } else {
    }
    return
  }
  func.func @transform_0(%arg0: i32, %arg1: i32) -> (i32, i32) {
    %c0_i32 = arith.constant 0 : i32
    return %arg0, %arg1 : i32, i32
  }
  func.func @transform_1(%arg0: i32, %arg1: i32) -> (i32, i32) {
    %c0_i32 = arith.constant 0 : i32
    %c0_i32_0 = arith.constant 0 : i32
    return %arg1, %c0_i32 : i32, i32
  }
  func.func @transform_2(%arg0: i32, %arg1: i32) -> (i32, i32) {
    %c0_i32 = arith.constant 0 : i32
    %c0_i32_0 = arith.constant 0 : i32
    %c0_i32_1 = arith.constant 0 : i32
    return %c0_i32, %c0_i32_0 : i32, i32
  }
  func.func @transform_3(%arg0: i32, %arg1: i32) -> (i32, i32) {
    %c0_i32 = arith.constant 0 : i32
    %c0_i32_0 = arith.constant 0 : i32
    return %arg0, %c0_i32 : i32, i32
  }
}

</mosaic_0001>

<bundles_post_ra>
// kernel: tpu_custom_call.1
= control target key start
LH: loop header
LB: loop body
LE: loop exit
PB: predicated region body
PF: predicated region fallthrough
CT: control target
= control target key end

     0   :  { %8 = vsyncpa [#allocation3], 0  ;;  %s656_s0 = inlined_call_operand.hbm [shape: bf16[128,128], index: 0, kind: input, shape index: {}]   ;;  %s657_s1 = inlined_call_operand.hbm [shape: bf16[128,128], index: 1, kind: input, shape index: {}]   ;;  %s658_s2 = inlined_call_operand.vmem [shape: f32[1,128], index: 2, kind: input, shape index: {}]   ;;  %s659_s3 = inlined_call_operand.hbm [shape: f32[128,128], index: 3, kind: output, shape index: {}]  }
   0x1   :  { %9 = vsyncpa [#allocation6], 0 }
   0x2   :  { %10 = vsyncpa [#allocation4], 0  ;;  %s590_s12 = smov [#allocation2]   ;;  %s518_s16 = scalar_lea.hbm %s656_s0, 1024 }
   0x3   :  { %s16_s13 = sshll.u32 %s590_s12, 4  ;;  %p519_p0 = scmp.ne.s32.totalorder %s656_s0, %s518_s16  ;;  %s17_s13 = int_to_ptr.vmem [resolvable:$true] %s16_s13 }
   0x4   :  { %p522_p1 = scmp.lt.u32.totalorder %s518_s16, %s656_s0 }
   0x6   :  { %p524_p2 = pnand %p522_p1, %p519_p0 }
   0x8   :  { %527 = shalt.err (!%p524_p2)
}
   0x9   :  { %s528_s21 = scalar_lea.vmem %s17_s13, 1024  ;;  %p533_p4 = scmp.lt.s32.totalorder %s17_s13, %s17_s13 }
   0xa   :  { %p529_p3 = scmp.ne.s32.totalorder %s17_s13, %s528_s21  ;;  %p534_p5 = scmp.lt.s32.totalorder %s528_s21, %s528_s21 }
   0xc   :  { %p535_p6 = por %p534_p5, %p533_p4 }
   0xe   :  { %p536_p7 = pnand %p535_p6, %p529_p3 }
  0x10   :  { %539 = shalt.err (!%p536_p7)
}
  0x11   :  { %s591_s22 = smov 64   ;;  %s592_s23 = smov 4  }
  0x12   :  { %22 = dma.hbm_to_vmem [thread:$0]  %s656_s0, 1024, %s17_s13, [#allocation3], %s591_s22, %s591_s22, %s592_s23  }
  0x13   :  { %s593_s26 = smov [#allocation5]   ;;  %s540_s30 = scalar_lea.hbm %s657_s1, 1024 }
  0x14   :  { %s28_s27 = sshll.u32 %s593_s26, 4  ;;  %p541_p8 = scmp.ne.s32.totalorder %s657_s1, %s540_s30  ;;  %s29_s27 = int_to_ptr.vmem [resolvable:$true] %s28_s27 }
  0x15   :  { %p544_p9 = scmp.lt.u32.totalorder %s540_s30, %s657_s1 }
  0x17   :  { %p546_p10 = pnand %p544_p9, %p541_p8 }
  0x19   :  { %549 = shalt.err (!%p546_p10)
}
  0x1a   :  { %s550_s8 = scalar_lea.vmem %s29_s27, 1024  ;;  %p555_p12 = scmp.lt.s32.totalorder %s29_s27, %s29_s27 }
  0x1b   :  { %p551_p11 = scmp.ne.s32.totalorder %s29_s27, %s550_s8  ;;  %p556_p13 = scmp.lt.s32.totalorder %s550_s8, %s550_s8 }
  0x1d   :  { %p557_p0 = por %p556_p13, %p555_p12 }
  0x1f   :  { %p558_p1 = pnand %p557_p0, %p551_p11 }
  0x21   :  { %561 = shalt.err (!%p558_p1)
}
  0x22   :  { %34 = dma.hbm_to_vmem [thread:$0]  %s657_s1, 1024, %s29_s27, [#allocation6], %s591_s22, %s591_s22, %s592_s23  }
  0x23   :  { %584 = dma.done.wait [#allocation3], 1024  }
  0x24   :  { %585 = vsyncadd [#allocation3], 4294966272 }
  0x25   :  { %586 = dma.done.wait [#allocation6], 1024  }
  0x26   :  { %587 = vsyncadd [#allocation6], 4294966272  ;;  %v502_v0 = vld [vmem:[#allocation5] sm:$0xff]   ;;  %v503_v1 = vld [vmem:[#allocation5 + $0x8] sm:$0xff]  }
  0x27   :  { %446 = vmatprep.subr.bf16.mxu0 %v502_v0  ;;  %478 = vmatprep.subr.bf16.mxu1 %v502_v0  ;;  %v504_v2 = vld [vmem:[#allocation5 + $0x10] sm:$0xff]   ;;  %v505_v3 = vld [vmem:[#allocation5 + $0x18] sm:$0xff]   ;;  %v510_v4 = vld [vmem:[#allocation2] sm:$0xff]  }
  0x28   :  { %447 = vmatpush3.bf16.msra.mxu0 %v502_v0  ;;  %486 = vmatpush3.bf16.msra.mxu1 %v502_v0  ;;  %v511_v5 = vld [vmem:[#allocation2 + $0x20] sm:$0xff]   ;;  %v507_v7 = vld [vmem:[#allocation5 + $0x28] sm:$0xff]   ;;  %v508_v8 = vld [vmem:[#allocation5 + $0x30] sm:$0xff]  }
  0x29   :  { %448 = vmatprep.subr.bf16.mxu0 %v503_v1  ;;  %479 = vmatprep.subr.bf16.mxu1 %v503_v1  ;;  %v506_v6 = vld [vmem:[#allocation5 + $0x20] sm:$0xff]   ;;  %v509_v9 = vld [vmem:[#allocation5 + $0x38] sm:$0xff]   ;;  %v512_v10 = vld [vmem:[#allocation2 + $0x8] sm:$0xff]  }
  0x2a   :  { %462 = vmatprep.mubr.bf16.mxu0 %v510_v4  ;;  %470 = vmatprep.mubr.bf16.mxu1 %v511_v5  ;;  %v513_v11 = vld [vmem:[#allocation2 + $0x28] sm:$0xff]   ;;  %v514_v12 = vld [vmem:[#allocation2 + $0x10] sm:$0xff]   ;;  %v516_v14 = vld [vmem:[#allocation2 + $0x18] sm:$0xff]  }
  0x2b   :  { %v515_v13 = vld [vmem:[#allocation2 + $0x30] sm:$0xff]   ;;  %v517_v15 = vld [vmem:[#allocation2 + $0x38] sm:$0xff]   ;;  %v429_v17 = vld [vmem:[%s658_s2] ss:$0 sm:$0xff]  ;;  %s594_s2 = smov [#allocation7]  }
  0x2c   :  { %449 = vmatpush3.bf16.msra.mxu0 %v503_v1  ;;  %487 = vmatpush3.bf16.msra.mxu1 %v503_v1  ;;  %s400_s11 = sshll.u32 %s594_s2, 4  ;;  %s401_s11 = int_to_ptr.vmem [resolvable:$true] %s400_s11 }
  0x2d   :  { %450 = vmatprep.subr.bf16.mxu0 %v504_v2  ;;  %480 = vmatprep.subr.bf16.mxu1 %v504_v2  ;;  %s562_s12 = scalar_lea.vmem %s401_s11, 2048  ;;  %p567_p3 = scmp.lt.s32.totalorder %s401_s11, %s401_s11 }
  0x2e   :  { %p563_p2 = scmp.ne.s32.totalorder %s401_s11, %s562_s12  ;;  %p568_p4 = scmp.lt.s32.totalorder %s562_s12, %s562_s12 }
  0x30   :  { %451 = vmatpush3.bf16.msra.mxu0 %v504_v2  ;;  %488 = vmatpush3.bf16.msra.mxu1 %v504_v2  ;;  %p569_p5 = por %p568_p4, %p567_p3 }
  0x31   :  { %452 = vmatprep.subr.bf16.mxu0 %v505_v3  ;;  %481 = vmatprep.subr.bf16.mxu1 %v505_v3 }
  0x32   :  { %p570_p6 = pnand %p569_p5, %p563_p2 }
  0x34   :  { %453 = vmatpush3.bf16.msra.mxu0 %v505_v3  ;;  %489 = vmatpush3.bf16.msra.mxu1 %v505_v3 }
  0x35   :  { %454 = vmatprep.subr.bf16.mxu0 %v506_v6  ;;  %482 = vmatprep.subr.bf16.mxu1 %v506_v6 }
  0x38   :  { %455 = vmatpush3.bf16.msra.mxu0 %v506_v6  ;;  %490 = vmatpush3.bf16.msra.mxu1 %v506_v6 }
  0x39   :  { %456 = vmatprep.subr.bf16.mxu0 %v507_v7  ;;  %483 = vmatprep.subr.bf16.mxu1 %v507_v7 }
  0x3c   :  { %457 = vmatpush3.bf16.msra.mxu0 %v507_v7  ;;  %491 = vmatpush3.bf16.msra.mxu1 %v507_v7 }
  0x3d   :  { %458 = vmatprep.subr.bf16.mxu0 %v508_v8  ;;  %484 = vmatprep.subr.bf16.mxu1 %v508_v8 }
  0x40   :  { %459 = vmatpush3.bf16.msra.mxu0 %v508_v8  ;;  %492 = vmatpush3.bf16.msra.mxu1 %v508_v8 }
  0x41   :  { %460 = vmatprep.subr.bf16.mxu0 %v509_v9  ;;  %485 = vmatprep.subr.bf16.mxu1 %v509_v9 }
  0x44   :  { %461 = vmatpush3.bf16.msra.mxu0 %v509_v9  ;;  %493 = vmatpush3.bf16.msra.mxu1 %v509_v9 }
  0x47   :  { %463 = vmatmul.mubr.bf16.vlgmr.msra.gmra.mrb[0].mxu0 %v512_v10  ;;  %471 = vmatmul.mubr.bf16.vlgmr.msra.gmra.mrb[0].mxu1 %v513_v11 }
  0x48   :  { %466 = vmatprep.mubr.bf16.mxu0 %v514_v12  ;;  %474 = vmatprep.mubr.bf16.mxu1 %v515_v13 }
  0x4f   :  { %467 = vmatmul.mubr.bf16.gmra.mrb[4].mxu0 %v516_v14  ;;  %475 = vmatmul.mubr.bf16.gmra.mrb[4].mxu1 %v517_v15 }
 0x11a   :  { %v464_v16 = vpop.f32.mrb[0].mxu0  ;;  %v472_v18 = vpop.f32.mrb[0].mxu1 }
 0x11b   :  { %v242_v19 = vpop.f32.mrb[1].mxu0  ;;  %v274_v20 = vpop.f32.mrb[1].mxu1  ;;  %v365_v23 = vadd.f32 %v464_v16, %v429_v17  ;;  %v373_v24 = vadd.f32 %v472_v18, %v429_v17 }
 0x11c   :  { %v465_v21 = vpop.f32.mrb[2].mxu0  ;;  %v473_v22 = vpop.f32.mrb[2].mxu1  ;;  %v363_v27 = vadd.f32 %v429_v17, %v242_v19  ;;  %v371_v28 = vadd.f32 %v429_v17, %v274_v20 }
 0x11d   :  { %v245_v25 = vpop.f32.mrb[3].mxu0  ;;  %v277_v26 = vpop.f32.mrb[3].mxu1  ;;  %381 = vst [vmem:[#allocation7 + $0x10] sm:$0xff] %v365_v23  ;;  %389 = vst [vmem:[#allocation7 + $0x50] sm:$0xff] %v373_v24  ;;  %v366_v29 = vadd.f32 %v465_v21, %v429_v17  ;;  %v374_v30 = vadd.f32 %v473_v22, %v429_v17 }
 0x11e   :  { %379 = vst [vmem:[#allocation7] sm:$0xff] %v363_v27  ;;  %387 = vst [vmem:[#allocation7 + $0x40] sm:$0xff] %v371_v28  ;;  %v364_v31 = vadd.f32 %v429_v17, %v245_v25  ;;  %v372_v32 = vadd.f32 %v429_v17, %v277_v26 }
 0x11f   :  { %382 = vst [vmem:[#allocation7 + $0x18] sm:$0xff] %v366_v29  ;;  %390 = vst [vmem:[#allocation7 + $0x58] sm:$0xff] %v374_v30 }
 0x120   :  { %380 = vst [vmem:[#allocation7 + $0x8] sm:$0xff] %v364_v31  ;;  %388 = vst [vmem:[#allocation7 + $0x48] sm:$0xff] %v372_v32 }
 0x122   :  { %v468_v33 = vpop.f32.mrb[4].mxu0  ;;  %v476_v34 = vpop.f32.mrb[4].mxu1 }
 0x123   :  { %v258_v35 = vpop.f32.mrb[5].mxu0  ;;  %v290_v36 = vpop.f32.mrb[5].mxu1  ;;  %v369_v39 = vadd.f32 %v468_v33, %v429_v17  ;;  %v377_v40 = vadd.f32 %v476_v34, %v429_v17 }
 0x124   :  { %v469_v37 = vpop.f32.mrb[6].mxu0  ;;  %v477_v38 = vpop.f32.mrb[6].mxu1  ;;  %v367_v43 = vadd.f32 %v429_v17, %v258_v35  ;;  %v375_v44 = vadd.f32 %v429_v17, %v290_v36 }
 0x125   :  { %v261_v41 = vpop.f32.mrb[7].mxu0  ;;  %v293_v42 = vpop.f32.mrb[7].mxu1  ;;  %385 = vst [vmem:[#allocation7 + $0x30] sm:$0xff] %v369_v39  ;;  %393 = vst [vmem:[#allocation7 + $0x70] sm:$0xff] %v377_v40  ;;  %v370_v45 = vadd.f32 %v469_v37, %v429_v17  ;;  %v378_v46 = vadd.f32 %v477_v38, %v429_v17 }
 0x126   :  { %383 = vst [vmem:[#allocation7 + $0x20] sm:$0xff] %v367_v43  ;;  %391 = vst [vmem:[#allocation7 + $0x60] sm:$0xff] %v375_v44  ;;  %v368_v47 = vadd.f32 %v429_v17, %v261_v41  ;;  %v376_v48 = vadd.f32 %v429_v17, %v293_v42 }
 0x127   :  { %386 = vst [vmem:[#allocation7 + $0x38] sm:$0xff] %v370_v45  ;;  %394 = vst [vmem:[#allocation7 + $0x78] sm:$0xff] %v378_v46 }
 0x128   :  { %384 = vst [vmem:[#allocation7 + $0x28] sm:$0xff] %v368_v47  ;;  %392 = vst [vmem:[#allocation7 + $0x68] sm:$0xff] %v376_v48 }
 0x129   :  { %573 = shalt.err (!%p570_p6)
}
 0x12a   :  { %s574_s15 = scalar_lea.hbm %s659_s3, 2048 }
 0x12b   :  { %p575_p7 = scmp.ne.s32.totalorder %s659_s3, %s574_s15  ;;  %p578_p8 = scmp.lt.u32.totalorder %s574_s15, %s659_s3 }
 0x12d   :  { %p580_p9 = pnand %p578_p8, %p575_p7 }
 0x12f   :  { %583 = shalt.err (!%p580_p9)
}
 0x130   :  { %s595_s20 = smov 128   ;;  %s596_s21 = smov 8  }
 0x131   :  { %406 = dma.vmem_to_hbm [thread:$0]  %s401_s11, 2048, %s659_s3, [#allocation4], %s595_s20, %s595_s20, %s596_s21  }
 0x132   :  { %588 = dma.done.wait [#allocation4], 2048  }
 0x133   :  { %589 = vsyncadd [#allocation4], 4294965248 }
 0x134   :  { %410 = vsyncpa [#allocation3], 1 }
 0x135   :  { %411 = vsyncpa [#allocation6], 1 }
 0x136   :  { %412 = vsyncpa [#allocation4], 1 }

</bundles_post_ra>
